<compile_context>
chip_gen: v5e
topology: v5e:2x2
jax: 0.10.0
libtpu: 0.0.40
codegen_flags: <defaults>
</compile_context>

<pallas_src>
import functools

import jax
import jax.numpy as jnp
import numpy as np
from jax.experimental import pallas as pl
from jax.experimental.pallas import tpu as pltpu


def _round_up(x: int, m: int) -> int:
    return ((x + m - 1) // m) * m


def _vmem_capacity_bytes() -> int:
    try:
        return int(pltpu.get_tpu_info().vmem_capacity_bytes)
    except Exception:
        return 64 * 1024 * 1024   # conservative: v7x per-TensorCore VMEM


def _pick_row_tile(n: int):
    """Largest row/contraction tile whose padding inflates A area <= ~8%."""
    np128 = _round_up(n, 128)
    for t in (1024, 512, 256):
        npt = _round_up(n, t)
        if npt * npt <= int(1.08 * np128 * np128):
            return t, npt
    return 128, np128


def _pick_lane_tile(dp: int) -> int:
    """tn covers the whole padded embedding dim when possible (A read once)."""
    if dp <= 512:
        return dp
    for t in (512, 256, 128):
        if dp % t == 0:
            return t
    return 128


# ----------------------------------------------------------------------------
# Pallas kernel: one LightGCN layer  E_new = A @ E  and  acc_out = acc_in + E_new.
# ----------------------------------------------------------------------------
def _lgcn_layer_kernel(a_ref, e_ref, acc_in_ref, *rest,
                       tk, e_resident, store_e_out):
    # a_ref      : (tm, tk)           bf16  tile of the normalized adjacency
    # e_ref      : (Np, tn)|(tk, tn)  bf16  resident / streamed E_k
    # acc_in_ref : (tm, tn)           f32   running layer-sum (aliased w/ out)
    # e_out_ref  : (tm, tn)           bf16  E_{k+1} tile (omitted on last layer)
    # acc_out_ref: (tm, tn)           f32   running layer-sum + E_{k+1}
    # acc_sc     : (tm, tn)           f32   VMEM matmul accumulator
    if store_e_out:
        e_out_ref, acc_out_ref, acc_sc = rest
    else:
        acc_out_ref, acc_sc = rest
        e_out_ref = None

    k = pl.program_id(2)

    @pl.when(k == 0)
    def _init():
        acc_sc[...] = jnp.zeros_like(acc_sc)

    if e_resident:
        start = pl.multiple_of(k * tk, tk)
        e_tile = e_ref[pl.ds(start, tk), :]
    else:
        e_tile = e_ref[...]

    acc_sc[...] += jnp.dot(a_ref[...], e_tile,
                           preferred_element_type=jnp.float32)

    @pl.when(k == pl.num_programs(2) - 1)
    def _finalize():
        e_new = acc_sc[...]
        if store_e_out:
            e_out_ref[...] = e_new.astype(e_out_ref.dtype)
        acc_out_ref[...] = acc_in_ref[...] + e_new


def _build_layer_call(Np, Dp, tm, tk, tn, e_resident, store_e_out, vmem_limit):
    grid = (Np // tm, Dp // tn, Np // tk)

    a_spec = pl.BlockSpec((tm, tk), lambda i, j, k: (i, k))
    if e_resident:
        # Index map independent of i and k -> DMA'd once, stays resident.
        e_spec = pl.BlockSpec((Np, tn), lambda i, j, k: (0, j))
    else:
        e_spec = pl.BlockSpec((tk, tn), lambda i, j, k: (k, j))
    acc_in_spec = pl.BlockSpec((tm, tn), lambda i, j, k: (i, j))
    tile_spec = pl.BlockSpec((tm, tn), lambda i, j, k: (i, j))

    if store_e_out:
        out_shape = (jax.ShapeDtypeStruct((Np, Dp), jnp.bfloat16),   # E_{k+1}
                     jax.ShapeDtypeStruct((Np, Dp), jnp.float32))    # layer sum
        out_specs = [tile_spec, tile_spec]
        aliases = {2: 1}                       # acc_in <-> acc_out
    else:
        out_shape = jax.ShapeDtypeStruct((Np, Dp), jnp.float32)      # layer sum
        out_specs = tile_spec
        aliases = {2: 0}

    kernel = functools.partial(_lgcn_layer_kernel, tk=tk,
                               e_resident=e_resident, store_e_out=store_e_out)

    bytes_accessed = (Np * Np * 2 * (Dp // tn)              # A stream
                      + Np * Dp * 2                          # E read
                      + Np * Dp * 4                          # acc_in read
                      + (Np * Dp * 2 if store_e_out else 0)  # E_{k+1} write
                      + Np * Dp * 4)                         # acc_out write

    return pl.pallas_call(
        kernel,
        out_shape=out_shape,
        grid_spec=pltpu.PrefetchScalarGridSpec(
            num_scalar_prefetch=0,
            grid=grid,
            in_specs=[a_spec, e_spec, acc_in_spec],
            out_specs=out_specs,
            scratch_shapes=[pltpu.VMEM((tm, tn), jnp.float32)],
        ),
        input_output_aliases=aliases,
        compiler_params=pltpu.CompilerParams(
            dimension_semantics=("parallel", "parallel", "arbitrary"),
            vmem_limit_bytes=vmem_limit,
        ),
        cost_estimate=pl.CostEstimate(
            flops=2 * Np * Np * Dp,
            transcendentals=0,
            bytes_accessed=bytes_accessed,
        ),
    )


# ----------------------------------------------------------------------------
# k-layer LightGCN propagation: mean_{l=0..K} (A^l @ E_0)
# ----------------------------------------------------------------------------
@functools.partial(jax.jit, static_argnames=("n_layers", "vmem_cap"))
def _lgcn_propagate(a_pad_bf16, ego_emb, *, n_layers, vmem_cap):
    Np = a_pad_bf16.shape[0]
    N, D = ego_emb.shape
    Dp = _round_up(D, 128)
    tn = _pick_lane_tile(Dp)

    # Largest contraction tile dividing the (already padded) Np.
    tk = 128
    for t in (1024, 512, 256):
        if Np % t == 0:
            tk = t
            break
    tm = tk
    # Keep >= 2 row panels so both v7x TensorCores get work (cheap on 1-TC chips).
    while Np // tm < 2 and tm > 128:
        tm //= 2

    # Resident E only when its double-buffered footprint is modest vs VMEM.
    e_resident = (2 * Np * tn * 2) <= int(0.40 * vmem_cap)

    buf_bytes = (2 * tm * tk * 2                                        # A (db)
                 + (2 * Np * tn * 2 if e_resident else 2 * tk * tn * 2)  # E
                 + 2 * tm * tn * 4                                       # acc_in
                 + 2 * tm * tn * 2                                       # e_out
                 + 2 * tm * tn * 4                                       # acc_out
                 + tm * tn * 4)                                          # scratch
    cap = (vmem_cap * 3) // 4          # ~48 MiB on v7x, ~96 MiB on v5e/v6e
    vmem_limit = int(min(max(buf_bytes + (4 << 20), 16 * 1024 * 1024), cap))

    e0 = jnp.zeros((Np, Dp), jnp.float32).at[:N, :D].set(
        ego_emb.astype(jnp.float32))
    e_bf = e0.astype(jnp.bfloat16)     # E_0 as fed to the MXU
    acc = e0                           # f32 running sum, starts at E_0

    if n_layers > 0:
        last_call = _build_layer_call(Np, Dp, tm, tk, tn, e_resident,
                                      store_e_out=False, vmem_limit=vmem_limit)
        if n_layers > 1:
            layer_call = _build_layer_call(Np, Dp, tm, tk, tn, e_resident,
                                           store_e_out=True,
                                           vmem_limit=vmem_limit)
            for _ in range(n_layers - 1):
                e_bf, acc = layer_call(a_pad_bf16, e_bf, acc)
        acc = last_call(a_pad_bf16, e_bf, acc)   # last layer: no dead E store

    mean = acc * (1.0 / float(n_layers + 1))
    return mean[:N, :D]


# ----------------------------------------------------------------------------
# Module-equivalent wrapper (parameter setup + gather = glue in plain JAX).
# ----------------------------------------------------------------------------
class LGCNEncoderPallas:
    def __init__(self, user_count, item_count, emb_size, norm_adj, n_layers=3,
                 key=None):
        self.user_count = user_count
        self.item_count = item_count
        self.emb_size = emb_size
        self.n_layers = n_layers

        N = user_count + item_count
        norm_adj = jnp.asarray(norm_adj, dtype=jnp.float32)
        assert norm_adj.shape == (N, N)

        # Padded bf16 adjacency, built once (hoisted out of the forward path).
        _, Np = _pick_row_tile(N)
        self.norm_adj_padded = (
            jnp.zeros((Np, Np), jnp.bfloat16)
            .at[:N, :N].set(norm_adj.astype(jnp.bfloat16)))
        self._vmem_cap = _vmem_capacity_bytes()

        if key is None:
            key = jax.random.PRNGKey(0)
        ku, ki = jax.random.split(key)

        # Xavier-uniform init, matching nn.init.xavier_uniform_ semantics.
        def xavier(k, shape):
            fan_out, fan_in = shape
            limit = float(np.sqrt(6.0 / (fan_in + fan_out)))
            return jax.random.uniform(k, shape, jnp.float32, -limit, limit)

        self.user_emb = xavier(ku, (user_count, emb_size))
        self.item_emb = xavier(ki, (item_count, emb_size))

    def forward(self, users: jax.Array, items: jax.Array):
        ego = jnp.concatenate([self.user_emb, self.item_emb], axis=0)  # (N, D)
        all_mean = _lgcn_propagate(self.norm_adj_padded, ego,
                                   n_layers=self.n_layers,
                                   vmem_cap=self._vmem_cap)            # (N, D)
        user_all = all_mean[: self.user_count, :]
        item_all = all_mean[self.user_count:, :]
        return user_all[users, :], item_all[items, :]

    __call__ = forward


# ----------------------------------------------------------------------------
# References for sanity checking.
# ----------------------------------------------------------------------------
def _reference_mixed(norm_adj, ego, n_layers):
    """Mimics the kernel numerics: bf16 MXU inputs, f32 accumulation."""
    a_bf = norm_adj.astype(jnp.bfloat16)
    e_bf = ego.astype(jnp.bfloat16)
    acc = ego.astype(jnp.float32)
    for _ in range(n_layers):
        e_f32 = jnp.dot(a_bf, e_bf, preferred_element_type=jnp.float32)
        acc = acc + e_f32
        e_bf = e_f32.astype(jnp.bfloat16)
    return acc / float(n_layers + 1)


def _reference_f32(norm_adj, ego, n_layers):
    """Original full-f32 torch semantics."""
    acc = ego
    e = ego
    for _ in range(n_layers):
        e = norm_adj @ e
        acc = acc + e
    return acc / float(n_layers + 1)


if __name__ == "__main__":
    user_count = 24
    item_count = 40
    emb_size = 32
    n_layers = 3
    N = user_count + item_count  # 64

    root = jax.random.PRNGKey(0)
    k_adj, k_emb, k_u, k_i = jax.random.split(root, 4)

    # Deterministic symmetric-normalized bipartite adjacency (dense stand-in
    # for the scipy sparse norm_adj).
    interact = (jax.random.uniform(k_adj, (user_count, item_count)) < 0.15
                ).astype(jnp.float32)
    A = jnp.zeros((N, N), jnp.float32)
    A = A.at[:user_count, user_count:].set(interact)
    A = A.at[user_count:, :user_count].set(interact.T)
    deg = jnp.clip(A.sum(axis=1), 1.0, None)
    d_inv_sqrt = 1.0 / jnp.sqrt(deg)
    norm_adj = A * d_inv_sqrt[:, None] * d_inv_sqrt[None, :]

    model = LGCNEncoderPallas(user_count, item_count, emb_size, norm_adj,
                              n_layers=n_layers, key=k_emb)

    users = jax.random.randint(k_u, (8,), 0, user_count)
    items = jax.random.randint(k_i, (8,), 0, item_count)

    u_emb, i_emb = model(users, items)
    u_emb = jax.block_until_ready(u_emb)
    i_emb = jax.block_until_ready(i_emb)

    ego = jnp.concatenate([model.user_emb, model.item_emb], axis=0)

    # Tight check against a reference with the same (bf16 MXU / f32 acc) numerics.
    mean_mixed = _reference_mixed(norm_adj, ego, n_layers)
    np.testing.assert_allclose(np.asarray(u_emb),
                               np.asarray(mean_mixed[:user_count][users]),
                               rtol=1e-4, atol=1e-4)
    np.testing.assert_allclose(np.asarray(i_emb),
                               np.asarray(mean_mixed[user_count:][items]),
                               rtol=1e-4, atol=1e-4)

    # Loose check against the original full-f32 semantics (bf16 rounding bound).
    mean_f32 = _reference_f32(norm_adj, ego, n_layers)
    np.testing.assert_allclose(np.asarray(u_emb),
                               np.asarray(mean_f32[:user_count][users]),
                               rtol=3e-2, atol=3e-2)
    np.testing.assert_allclose(np.asarray(i_emb),
                               np.asarray(mean_f32[user_count:][items]),
                               rtol=3e-2, atol=3e-2)

    print("KERNEL_OK")
</pallas_src>

<mosaic_0001>
module attributes {stable_mosaic.version = 11 : i64} {
  func.func @_lgcn_layer_kernel(%arg0: i32, %arg1: i32, %arg2: i32, %arg3: memref<128x128xbf16, #tpu.memory_space<vmem>>, %arg4: memref<128x128xbf16, #tpu.memory_space<vmem>>, %arg5: memref<128x128xf32, #tpu.memory_space<vmem>>, %arg6: memref<128x128xbf16, #tpu.memory_space<vmem>>, %arg7: memref<128x128xf32, #tpu.memory_space<vmem>>, %arg8: memref<128x128xf32, #tpu.memory_space<vmem>>) attributes {dimension_semantics = [#tpu.dimension_semantics<parallel>, #tpu.dimension_semantics<parallel>, #tpu.dimension_semantics<arbitrary>], iteration_bounds = array<i64: 1, 1, 1>, scalar_prefetch = 0 : i64, scratch_operands = 1 : i64, tpu.core_type = #tpu.core_type<tc>, window_params = [{transform_indices = @transform_0, window_bounds = array<i64: 128, 128>}, {transform_indices = @transform_1, window_bounds = array<i64: 128, 128>}, {transform_indices = @transform_2, window_bounds = array<i64: 128, 128>}, {transform_indices = @transform_3, window_bounds = array<i64: 128, 128>}, {transform_indices = @transform_4, window_bounds = array<i64: 128, 128>}]} {
    %c0_i32 = arith.constant 0 : i32
    %0 = arith.cmpi eq, %arg2, %c0_i32 : i32
    %1 = arith.extui %0 : i1 to i32
    %c0_i32_0 = arith.constant 0 : i32
    %2 = arith.cmpi ne, %1, %c0_i32_0 : i32
    scf.if %2 {
      %cst_9 = arith.constant 0.000000e+00 : f32
      %15 = vector.broadcast %cst_9 : f32 to vector<128x128xf32>
      %c0_10 = arith.constant 0 : index
      %c0_11 = arith.constant 0 : index
      %16 = vector.load %arg8[%c0_10, %c0_11] : memref<128x128xf32, #tpu.memory_space<vmem>>, vector<128x128xf32>
      tpu.vector_store %arg8[%c0_10, %c0_11], %15 {strides = array<i32>} : memref<128x128xf32, #tpu.memory_space<vmem>>, vector<128x128xf32>,
    } else {
    }
    %c128_i32 = arith.constant 128 : i32
    %3 = arith.muli %arg2, %c128_i32 : i32
    %4 = tpu.assume_multiple %3, 128 : i32
    %5 = arith.index_cast %4 : i32 to index
    %c0 = arith.constant 0 : index
    %6 = vector.load %arg4[%5, %c0] : memref<128x128xbf16, #tpu.memory_space<vmem>>, vector<128x128xbf16>
    %c0_1 = arith.constant 0 : index
    %c0_2 = arith.constant 0 : index
    %7 = vector.load %arg8[%c0_1, %c0_2] : memref<128x128xf32, #tpu.memory_space<vmem>>, vector<128x128xf32>
    %c0_3 = arith.constant 0 : index
    %c0_4 = arith.constant 0 : index
    %8 = vector.load %arg3[%c0_3, %c0_4] : memref<128x128xbf16, #tpu.memory_space<vmem>>, vector<128x128xbf16>
    %cst = arith.constant dense<0.000000e+00> : vector<128x128xf32>
    %9 = tpu.matmul %8, %6, %cst {dimension_numbers = #tpu.dot_dimension_numbers<[1], [0], [0], [1], [0, 0, 1, 1], [], []>} : vector<128x128xbf16>, vector<128x128xbf16>, vector<128x128xf32> -> vector<128x128xf32>
    %10 = arith.addf %7, %9 : vector<128x128xf32>
    %c0_5 = arith.constant 0 : index
    %c0_6 = arith.constant 0 : index
    %11 = vector.load %arg8[%c0_5, %c0_6] : memref<128x128xf32, #tpu.memory_space<vmem>>, vector<128x128xf32>
    tpu.vector_store %arg8[%c0_5, %c0_6], %10 {strides = array<i32>} : memref<128x128xf32, #tpu.memory_space<vmem>>, vector<128x128xf32>,
    %c0_i32_7 = arith.constant 0 : i32
    %12 = arith.cmpi eq, %arg2, %c0_i32_7 : i32
    %13 = arith.extui %12 : i1 to i32
    %c0_i32_8 = arith.constant 0 : i32
    %14 = arith.cmpi ne, %13, %c0_i32_8 : i32
    scf.if %14 {
      %c0_9 = arith.constant 0 : index
      %c0_10 = arith.constant 0 : index
      %15 = vector.load %arg8[%c0_9, %c0_10] : memref<128x128xf32, #tpu.memory_space<vmem>>, vector<128x128xf32>
      %16 = arith.truncf %15 : vector<128x128xf32> to vector<128x128xbf16>
      %c0_11 = arith.constant 0 : index
      %c0_12 = arith.constant 0 : index
      %17 = vector.load %arg6[%c0_11, %c0_12] : memref<128x128xbf16, #tpu.memory_space<vmem>>, vector<128x128xbf16>
      tpu.vector_store %arg6[%c0_11, %c0_12], %16 {strides = array<i32>} : memref<128x128xbf16, #tpu.memory_space<vmem>>, vector<128x128xbf16>,
      %c0_13 = arith.constant 0 : index
      %c0_14 = arith.constant 0 : index
      %18 = vector.load %arg5[%c0_13, %c0_14] : memref<128x128xf32, #tpu.memory_space<vmem>>, vector<128x128xf32>
      %19 = arith.addf %18, %15 : vector<128x128xf32>
      %c0_15 = arith.constant 0 : index
      %c0_16 = arith.constant 0 : index
      %20 = vector.load %arg7[%c0_15, %c0_16] : memref<128x128xf32, #tpu.memory_space<vmem>>, vector<128x128xf32>
      tpu.vector_store %arg7[%c0_15, %c0_16], %19 {strides = array<i32>} : memref<128x128xf32, #tpu.memory_space<vmem>>, vector<128x128xf32>,
    } else {
    }
    return
  }
  func.func @transform_0(%arg0: i32, %arg1: i32, %arg2: i32) -> (i32, i32) {
    %c0_i32 = arith.constant 0 : i32
    return %arg0, %arg2 : i32, i32
  }
  func.func @transform_1(%arg0: i32, %arg1: i32, %arg2: i32) -> (i32, i32) {
    %c0_i32 = arith.constant 0 : i32
    %c0_i32_0 = arith.constant 0 : i32
    return %c0_i32, %arg1 : i32, i32
  }
  func.func @transform_2(%arg0: i32, %arg1: i32, %arg2: i32) -> (i32, i32) {
    %c0_i32 = arith.constant 0 : i32
    return %arg0, %arg1 : i32, i32
  }
  func.func @transform_3(%arg0: i32, %arg1: i32, %arg2: i32) -> (i32, i32) {
    %c0_i32 = arith.constant 0 : i32
    return %arg0, %arg1 : i32, i32
  }
  func.func @transform_4(%arg0: i32, %arg1: i32, %arg2: i32) -> (i32, i32) {
    %c0_i32 = arith.constant 0 : i32
    return %arg0, %arg1 : i32, i32
  }
}

module attributes {stable_mosaic.version = 11 : i64} {
  func.func @_lgcn_layer_kernel(%arg0: i32, %arg1: i32, %arg2: i32, %arg3: memref<128x128xbf16, #tpu.memory_space<vmem>>, %arg4: memref<128x128xbf16, #tpu.memory_space<vmem>>, %arg5: memref<128x128xf32, #tpu.memory_space<vmem>>, %arg6: memref<128x128xf32, #tpu.memory_space<vmem>>, %arg7: memref<128x128xf32, #tpu.memory_space<vmem>>) attributes {dimension_semantics = [#tpu.dimension_semantics<parallel>, #tpu.dimension_semantics<parallel>, #tpu.dimension_semantics<arbitrary>], iteration_bounds = array<i64: 1, 1, 1>, scalar_prefetch = 0 : i64, scratch_operands = 1 : i64, tpu.core_type = #tpu.core_type<tc>, window_params = [{transform_indices = @transform_0, window_bounds = array<i64: 128, 128>}, {transform_indices = @transform_1, window_bounds = array<i64: 128, 128>}, {transform_indices = @transform_2, window_bounds = array<i64: 128, 128>}, {transform_indices = @transform_3, window_bounds = array<i64: 128, 128>}]} {
    %c0_i32 = arith.constant 0 : i32
    %0 = arith.cmpi eq, %arg2, %c0_i32 : i32
    %1 = arith.extui %0 : i1 to i32
    %c0_i32_0 = arith.constant 0 : i32
    %2 = arith.cmpi ne, %1, %c0_i32_0 : i32
    scf.if %2 {
      %cst_9 = arith.constant 0.000000e+00 : f32
      %15 = vector.broadcast %cst_9 : f32 to vector<128x128xf32>
      %c0_10 = arith.constant 0 : index
      %c0_11 = arith.constant 0 : index
      %16 = vector.load %arg7[%c0_10, %c0_11] : memref<128x128xf32, #tpu.memory_space<vmem>>, vector<128x128xf32>
      tpu.vector_store %arg7[%c0_10, %c0_11], %15 {strides = array<i32>} : memref<128x128xf32, #tpu.memory_space<vmem>>, vector<128x128xf32>,
    } else {
    }
    %c128_i32 = arith.constant 128 : i32
    %3 = arith.muli %arg2, %c128_i32 : i32
    %4 = tpu.assume_multiple %3, 128 : i32
    %5 = arith.index_cast %4 : i32 to index
    %c0 = arith.constant 0 : index
    %6 = vector.load %arg4[%5, %c0] : memref<128x128xbf16, #tpu.memory_space<vmem>>, vector<128x128xbf16>
    %c0_1 = arith.constant 0 : index
    %c0_2 = arith.constant 0 : index
    %7 = vector.load %arg7[%c0_1, %c0_2] : memref<128x128xf32, #tpu.memory_space<vmem>>, vector<128x128xf32>
    %c0_3 = arith.constant 0 : index
    %c0_4 = arith.constant 0 : index
    %8 = vector.load %arg3[%c0_3, %c0_4] : memref<128x128xbf16, #tpu.memory_space<vmem>>, vector<128x128xbf16>
    %cst = arith.constant dense<0.000000e+00> : vector<128x128xf32>
    %9 = tpu.matmul %8, %6, %cst {dimension_numbers = #tpu.dot_dimension_numbers<[1], [0], [0], [1], [0, 0, 1, 1], [], []>} : vector<128x128xbf16>, vector<128x128xbf16>, vector<128x128xf32> -> vector<128x128xf32>
    %10 = arith.addf %7, %9 : vector<128x128xf32>
    %c0_5 = arith.constant 0 : index
    %c0_6 = arith.constant 0 : index
    %11 = vector.load %arg7[%c0_5, %c0_6] : memref<128x128xf32, #tpu.memory_space<vmem>>, vector<128x128xf32>
    tpu.vector_store %arg7[%c0_5, %c0_6], %10 {strides = array<i32>} : memref<128x128xf32, #tpu.memory_space<vmem>>, vector<128x128xf32>,
    %c0_i32_7 = arith.constant 0 : i32
    %12 = arith.cmpi eq, %arg2, %c0_i32_7 : i32
    %13 = arith.extui %12 : i1 to i32
    %c0_i32_8 = arith.constant 0 : i32
    %14 = arith.cmpi ne, %13, %c0_i32_8 : i32
    scf.if %14 {
      %c0_9 = arith.constant 0 : index
      %c0_10 = arith.constant 0 : index
      %15 = vector.load %arg7[%c0_9, %c0_10] : memref<128x128xf32, #tpu.memory_space<vmem>>, vector<128x128xf32>
      %c0_11 = arith.constant 0 : index
      %c0_12 = arith.constant 0 : index
      %16 = vector.load %arg5[%c0_11, %c0_12] : memref<128x128xf32, #tpu.memory_space<vmem>>, vector<128x128xf32>
      %17 = arith.addf %16, %15 : vector<128x128xf32>
      %c0_13 = arith.constant 0 : index
      %c0_14 = arith.constant 0 : index
      %18 = vector.load %arg6[%c0_13, %c0_14] : memref<128x128xf32, #tpu.memory_space<vmem>>, vector<128x128xf32>
      tpu.vector_store %arg6[%c0_13, %c0_14], %17 {strides = array<i32>} : memref<128x128xf32, #tpu.memory_space<vmem>>, vector<128x128xf32>,
    } else {
    }
    return
  }
  func.func @transform_0(%arg0: i32, %arg1: i32, %arg2: i32) -> (i32, i32) {
    %c0_i32 = arith.constant 0 : i32
    return %arg0, %arg2 : i32, i32
  }
  func.func @transform_1(%arg0: i32, %arg1: i32, %arg2: i32) -> (i32, i32) {
    %c0_i32 = arith.constant 0 : i32
    %c0_i32_0 = arith.constant 0 : i32
    return %c0_i32, %arg1 : i32, i32
  }
  func.func @transform_2(%arg0: i32, %arg1: i32, %arg2: i32) -> (i32, i32) {
    %c0_i32 = arith.constant 0 : i32
    return %arg0, %arg1 : i32, i32
  }
  func.func @transform_3(%arg0: i32, %arg1: i32, %arg2: i32) -> (i32, i32) {
    %c0_i32 = arith.constant 0 : i32
    return %arg0, %arg1 : i32, i32
  }
}

</mosaic_0001>

<bundles_post_ra>
// kernel: _lgcn_propagate.3
= control target key start
LH: loop header
LB: loop body
LE: loop exit
PB: predicated region body
PF: predicated region fallthrough
CT: control target
= control target key end

     0   :  { %s719_s1 = inlined_call_operand.vmem [shape: bf16[128,128], index: 1, kind: input, shape index: {}]   ;;  %s720_s0 = inlined_call_operand.vmem [shape: bf16[128,128], index: 0, kind: input, shape index: {}]   ;;  %s721_s2 = inlined_call_operand.vmem [shape: f32[128,128], index: 2, kind: input, shape index: {}, may-alias: {2,4}]   ;;  %s722_s4 = inlined_call_operand.vmem [shape: f32[128,128], index: 4, kind: output, shape index: {1}, may-alias: {2,4}]   ;;  %s723_s3 = inlined_call_operand.vmem [shape: bf16[128,128], index: 3, kind: output, shape index: {0}]  }
   0x1   :  { %v446_v0 = vld [vmem:[%s719_s1 + $0x38] sm:$0xff]  ;;  %v445_v1 = vld [vmem:[%s719_s1 + $0x30] sm:$0xff]  ;;  %v444_v2 = vld [vmem:[%s719_s1 + $0x28] sm:$0xff] }
   0x2   :  { %185 = vmatpush.bf16.msra.mxu0 %v446_v0  ;;  %502 = vmatpush.bf16.msra.mxu1 %v446_v0  ;;  %v443_v3 = vld [vmem:[%s719_s1 + $0x20] sm:$0xff]  ;;  %v442_v4 = vld [vmem:[%s719_s1 + $0x18] sm:$0xff]  ;;  %v441_v5 = vld [vmem:[%s719_s1 + $0x10] sm:$0xff] }
   0x3   :  { %503 = vmatpush.bf16.msra.mxu2 %v446_v0  ;;  %504 = vmatpush.bf16.msra.mxu3 %v446_v0  ;;  %v440_v6 = vld [vmem:[%s719_s1 + $0x8] sm:$0xff]  ;;  %v439_v7 = vld [vmem:[%s719_s1] sm:$0xff]  ;;  %v449_v9 = vld [vmem:[%s720_s0 + $0x10] sm:$0xff] }
   0x4   :  { %v447_v8 = vld [vmem:[%s720_s0] sm:$0xff]  ;;  %v453_v11 = vld [vmem:[%s720_s0 + $0x30] sm:$0xff]  ;;  %v448_v12 = vld [vmem:[%s720_s0 + $0x8] sm:$0xff] }
   0x5   :  { %v451_v10 = vld [vmem:[%s720_s0 + $0x20] sm:$0xff]  ;;  %v450_v13 = vld [vmem:[%s720_s0 + $0x18] sm:$0xff]  ;;  %v452_v14 = vld [vmem:[%s720_s0 + $0x28] sm:$0xff] }
   0x6   :  { %186 = vmatpush.bf16.msra.mxu0 %v445_v1  ;;  %505 = vmatpush.bf16.msra.mxu1 %v445_v1  ;;  %v454_v15 = vld [vmem:[%s720_s0 + $0x38] sm:$0xff]  ;;  %v317_v16 = vld [vmem:[%s721_s2] sm:$0xff] }
   0x7   :  { %506 = vmatpush.bf16.msra.mxu2 %v445_v1  ;;  %507 = vmatpush.bf16.msra.mxu3 %v445_v1  ;;  %v321_v17 = vld [vmem:[%s721_s2 + $0x20] sm:$0xff] }
   0xa   :  { %187 = vmatpush.bf16.msra.mxu0 %v444_v2  ;;  %508 = vmatpush.bf16.msra.mxu1 %v444_v2 }
   0xb   :  { %509 = vmatpush.bf16.msra.mxu2 %v444_v2  ;;  %510 = vmatpush.bf16.msra.mxu3 %v444_v2 }
   0xe   :  { %188 = vmatpush.bf16.msra.mxu0 %v443_v3  ;;  %511 = vmatpush.bf16.msra.mxu1 %v443_v3 }
   0xf   :  { %512 = vmatpush.bf16.msra.mxu2 %v443_v3  ;;  %513 = vmatpush.bf16.msra.mxu3 %v443_v3 }
  0x12   :  { %189 = vmatpush.bf16.msra.mxu0 %v442_v4  ;;  %514 = vmatpush.bf16.msra.mxu1 %v442_v4 }
  0x13   :  { %515 = vmatpush.bf16.msra.mxu2 %v442_v4  ;;  %516 = vmatpush.bf16.msra.mxu3 %v442_v4 }
  0x16   :  { %190 = vmatpush.bf16.msra.mxu0 %v441_v5  ;;  %517 = vmatpush.bf16.msra.mxu1 %v441_v5 }
  0x17   :  { %518 = vmatpush.bf16.msra.mxu2 %v441_v5  ;;  %519 = vmatpush.bf16.msra.mxu3 %v441_v5 }
  0x1a   :  { %191 = vmatpush.bf16.msra.mxu0 %v440_v6  ;;  %520 = vmatpush.bf16.msra.mxu1 %v440_v6 }
  0x1b   :  { %521 = vmatpush.bf16.msra.mxu2 %v440_v6  ;;  %522 = vmatpush.bf16.msra.mxu3 %v440_v6 }
  0x1e   :  { %192 = vmatpush.bf16.msra.mxu0 %v439_v7  ;;  %523 = vmatpush.bf16.msra.mxu1 %v439_v7 }
  0x1f   :  { %524 = vmatpush.bf16.msra.mxu2 %v439_v7  ;;  %525 = vmatpush.bf16.msra.mxu3 %v439_v7 }
  0x21   :  { %193 = vmatmul.bf16.vlgmr.msra.gmra.mxu0 %v447_v8  ;;  %203 = vmatmul.bf16.vlgmr.msra.gmra.mxu1 %v449_v9 }
  0x22   :  { %213 = vmatmul.bf16.vlgmr.msra.gmra.mxu2 %v451_v10  ;;  %223 = vmatmul.bf16.vlgmr.msra.gmra.mxu3 %v453_v11 }
  0x31   :  { %198 = vmatmul.bf16.gmra.mxu0 %v448_v12  ;;  %208 = vmatmul.bf16.gmra.mxu1 %v450_v13 }
  0x32   :  { %218 = vmatmul.bf16.gmra.mxu2 %v452_v14  ;;  %228 = vmatmul.bf16.gmra.mxu3 %v454_v15 }
  0x9e   :  { %v194_v18 = vpop.f32.mrf.mxu0  ;;  %v204_v19 = vpop.f32.mrf.mxu1 }
  0x9f   :  { %v333_v20 = vadd.f32 %v317_v16, %v194_v18  ;;  %v337_v21 = vadd.f32 %v321_v17, %v204_v19 }
  0xa1   :  { %349 = vst [vmem:[%s722_s4] sm:$0xff] %v333_v20 }
  0xa2   :  { %353 = vst [vmem:[%s722_s4 + $0x20] sm:$0xff] %v337_v21 }
  0xa5   :  { %v214_v25 = vpop.f32.mrf.mxu2  ;;  %v224_v26 = vpop.f32.mrf.mxu3 }
  0xa6   :  { %v196_v29 = vpop.f32.mrf.mxu0  ;;  %v206_v30 = vpop.f32.mrf.mxu1 }
  0xa7   :  { %v458_v32 = vpack.c.bf16 %v196_v29, %v194_v18  ;;  %v468_v34 = vpack.c.bf16 %v206_v30, %v204_v19 }
  0xa9   :  { %v325_v22 = vld [vmem:[%s721_s2 + $0x40] sm:$0xff]  ;;  %v318_v24 = vld [vmem:[%s721_s2 + $0x8] sm:$0xff]  ;;  %459 = vst [vmem:[%s723_s3] sm:$0xff] %v458_v32  }
  0xaa   :  { %v329_v23 = vld [vmem:[%s721_s2 + $0x60] sm:$0xff]  ;;  %v341_v27 = vadd.f32 %v325_v22, %v214_v25  ;;  %v322_v31 = vld [vmem:[%s721_s2 + $0x28] sm:$0xff]  ;;  %v334_v33 = vadd.f32 %v318_v24, %v196_v29  ;;  %496 = vst [vmem:[%s723_s3 + $0x10] sm:$0xff] %v468_v34  }
  0xab   :  { %v345_v28 = vadd.f32 %v329_v23, %v224_v26  ;;  %v338_v35 = vadd.f32 %v322_v31, %v206_v30 }
  0xac   :  { %357 = vst [vmem:[%s722_s4 + $0x40] sm:$0xff] %v341_v27 }
  0xad   :  { %361 = vst [vmem:[%s722_s4 + $0x60] sm:$0xff] %v345_v28  ;;  %v216_v38 = vpop.f32.mrf.mxu2  ;;  %v226_v39 = vpop.f32.mrf.mxu3 }
  0xae   :  { %350 = vst [vmem:[%s722_s4 + $0x8] sm:$0xff] %v334_v33  ;;  %v478_v41 = vpack.c.bf16 %v216_v38, %v214_v25  ;;  %v488_v43 = vpack.c.bf16 %v226_v39, %v224_v26  ;;  %v199_v44 = vpop.f32.mrf.mxu0  ;;  %v209_v45 = vpop.f32.mrf.mxu1 }
  0xb0   :  { %498 = vst [vmem:[%s723_s3 + $0x20] sm:$0xff] %v478_v41  }
  0xb1   :  { %500 = vst [vmem:[%s723_s3 + $0x30] sm:$0xff] %v488_v43  }
  0xb5   :  { %v326_v36 = vld [vmem:[%s721_s2 + $0x48] sm:$0xff]  ;;  %v219_v53 = vpop.f32.mrf.mxu2  ;;  %v229_v54 = vpop.f32.mrf.mxu3 }
  0xb6   :  { %v330_v37 = vld [vmem:[%s721_s2 + $0x68] sm:$0xff]  ;;  %v342_v42 = vadd.f32 %v326_v36, %v216_v38  ;;  %v201_v57 = vpop.f32.mrf.mxu0  ;;  %v211_v58 = vpop.f32.mrf.mxu1 }
  0xb7   :  { %354 = vst [vmem:[%s722_s4 + $0x28] sm:$0xff] %v338_v35  ;;  %v346_v47 = vadd.f32 %v330_v37, %v226_v39  ;;  %v463_v60 = vpack.c.bf16 %v201_v57, %v199_v44  ;;  %v473_v62 = vpack.c.bf16 %v211_v58, %v209_v45 }
  0xb9   :  { %495 = vst [vmem:[%s723_s3 + $0x8] sm:$0xff] %v463_v60  }
  0xba   :  { %497 = vst [vmem:[%s723_s3 + $0x18] sm:$0xff] %v473_v62  }
  0xbd   :  { %v221_v2 = vpop.f32.mrf.mxu2  ;;  %v231_v3 = vpop.f32.mrf.mxu3 }
  0xbe   :  { %v319_v40 = vld [vmem:[%s721_s2 + $0x10] sm:$0xff]  ;;  %v483_v4 = vpack.c.bf16 %v221_v2, %v219_v53  ;;  %v493_v6 = vpack.c.bf16 %v231_v3, %v229_v54 }
  0xbf   :  { %v323_v46 = vld [vmem:[%s721_s2 + $0x30] sm:$0xff]  ;;  %v335_v48 = vadd.f32 %v319_v40, %v199_v44 }
  0xc0   :  { %358 = vst [vmem:[%s722_s4 + $0x48] sm:$0xff] %v342_v42  ;;  %v339_v49 = vadd.f32 %v323_v46, %v209_v45 }
  0xc1   :  { %362 = vst [vmem:[%s722_s4 + $0x68] sm:$0xff] %v346_v47 }
  0xc2   :  { %499 = vst [vmem:[%s723_s3 + $0x28] sm:$0xff] %v483_v4  }
  0xc3   :  { %501 = vst [vmem:[%s723_s3 + $0x38] sm:$0xff] %v493_v6  }
  0xc8   :  { %v327_v50 = vld [vmem:[%s721_s2 + $0x50] sm:$0xff] }
  0xc9   :  { %v331_v51 = vld [vmem:[%s721_s2 + $0x70] sm:$0xff]  ;;  %v343_v55 = vadd.f32 %v327_v50, %v219_v53 }
  0xca   :  { %351 = vst [vmem:[%s722_s4 + $0x10] sm:$0xff] %v335_v48  ;;  %v347_v56 = vadd.f32 %v331_v51, %v229_v54 }
  0xd1   :  { %v320_v52 = vld [vmem:[%s721_s2 + $0x18] sm:$0xff] }
  0xd2   :  { %355 = vst [vmem:[%s722_s4 + $0x30] sm:$0xff] %v339_v49  ;;  %v336_v61 = vadd.f32 %v320_v52, %v201_v57 }
  0xd9   :  { %v324_v59 = vld [vmem:[%s721_s2 + $0x38] sm:$0xff] }
  0xda   :  { %359 = vst [vmem:[%s722_s4 + $0x50] sm:$0xff] %v343_v55  ;;  %v340_v63 = vadd.f32 %v324_v59, %v211_v58 }
  0xdb   :  { %363 = vst [vmem:[%s722_s4 + $0x70] sm:$0xff] %v347_v56 }
  0xdc   :  { %352 = vst [vmem:[%s722_s4 + $0x18] sm:$0xff] %v336_v61 }
  0xe3   :  { %v328_v0 = vld [vmem:[%s721_s2 + $0x58] sm:$0xff] }
  0xe4   :  { %v332_v1 = vld [vmem:[%s721_s2 + $0x78] sm:$0xff]  ;;  %v344_v5 = vadd.f32 %v328_v0, %v221_v2 }
  0xe5   :  { %356 = vst [vmem:[%s722_s4 + $0x38] sm:$0xff] %v340_v63  ;;  %v348_v7 = vadd.f32 %v332_v1, %v231_v3 }
  0xe6   :  { %360 = vst [vmem:[%s722_s4 + $0x58] sm:$0xff] %v344_v5 }
  0xe7   :  { %364 = vst [vmem:[%s722_s4 + $0x78] sm:$0xff] %v348_v7 }

// kernel: _lgcn_propagate.5
= control target key start
LH: loop header
LB: loop body
LE: loop exit
PB: predicated region body
PF: predicated region fallthrough
CT: control target
= control target key end

     0   :  { %s605_s1 = inlined_call_operand.vmem [shape: bf16[128,128], index: 1, kind: input, shape index: {}]   ;;  %s606_s0 = inlined_call_operand.vmem [shape: bf16[128,128], index: 0, kind: input, shape index: {}]   ;;  %s607_s2 = inlined_call_operand.vmem [shape: f32[128,128], index: 2, kind: input, shape index: {}, may-alias: {2,3}]   ;;  %s608_s3 = inlined_call_operand.vmem [shape: f32[128,128], index: 3, kind: output, shape index: {}, may-alias: {2,3}]  }
   0x1   :  { %v408_v0 = vld [vmem:[%s605_s1 + $0x38] sm:$0xff]  ;;  %v407_v1 = vld [vmem:[%s605_s1 + $0x30] sm:$0xff]  ;;  %v406_v2 = vld [vmem:[%s605_s1 + $0x28] sm:$0xff] }
   0x2   :  { %183 = vmatpush.bf16.msra.mxu0 %v408_v0  ;;  %417 = vmatpush.bf16.msra.mxu1 %v408_v0  ;;  %v405_v3 = vld [vmem:[%s605_s1 + $0x20] sm:$0xff]  ;;  %v404_v4 = vld [vmem:[%s605_s1 + $0x18] sm:$0xff]  ;;  %v403_v5 = vld [vmem:[%s605_s1 + $0x10] sm:$0xff] }
   0x3   :  { %418 = vmatpush.bf16.msra.mxu2 %v408_v0  ;;  %419 = vmatpush.bf16.msra.mxu3 %v408_v0  ;;  %v402_v6 = vld [vmem:[%s605_s1 + $0x8] sm:$0xff]  ;;  %v401_v7 = vld [vmem:[%s605_s1] sm:$0xff]  ;;  %v411_v9 = vld [vmem:[%s606_s0 + $0x10] sm:$0xff] }
   0x4   :  { %v409_v8 = vld [vmem:[%s606_s0] sm:$0xff]  ;;  %v415_v11 = vld [vmem:[%s606_s0 + $0x30] sm:$0xff]  ;;  %v410_v12 = vld [vmem:[%s606_s0 + $0x8] sm:$0xff] }
   0x5   :  { %v413_v10 = vld [vmem:[%s606_s0 + $0x20] sm:$0xff]  ;;  %v412_v13 = vld [vmem:[%s606_s0 + $0x18] sm:$0xff]  ;;  %v414_v14 = vld [vmem:[%s606_s0 + $0x28] sm:$0xff] }
   0x6   :  { %184 = vmatpush.bf16.msra.mxu0 %v407_v1  ;;  %420 = vmatpush.bf16.msra.mxu1 %v407_v1  ;;  %v416_v15 = vld [vmem:[%s606_s0 + $0x38] sm:$0xff]  ;;  %v283_v16 = vld [vmem:[%s607_s2] sm:$0xff] }
   0x7   :  { %421 = vmatpush.bf16.msra.mxu2 %v407_v1  ;;  %422 = vmatpush.bf16.msra.mxu3 %v407_v1  ;;  %v287_v17 = vld [vmem:[%s607_s2 + $0x20] sm:$0xff] }
   0xa   :  { %185 = vmatpush.bf16.msra.mxu0 %v406_v2  ;;  %423 = vmatpush.bf16.msra.mxu1 %v406_v2 }
   0xb   :  { %424 = vmatpush.bf16.msra.mxu2 %v406_v2  ;;  %425 = vmatpush.bf16.msra.mxu3 %v406_v2 }
   0xe   :  { %186 = vmatpush.bf16.msra.mxu0 %v405_v3  ;;  %426 = vmatpush.bf16.msra.mxu1 %v405_v3 }
   0xf   :  { %427 = vmatpush.bf16.msra.mxu2 %v405_v3  ;;  %428 = vmatpush.bf16.msra.mxu3 %v405_v3 }
  0x12   :  { %187 = vmatpush.bf16.msra.mxu0 %v404_v4  ;;  %429 = vmatpush.bf16.msra.mxu1 %v404_v4 }
  0x13   :  { %430 = vmatpush.bf16.msra.mxu2 %v404_v4  ;;  %431 = vmatpush.bf16.msra.mxu3 %v404_v4 }
  0x16   :  { %188 = vmatpush.bf16.msra.mxu0 %v403_v5  ;;  %432 = vmatpush.bf16.msra.mxu1 %v403_v5 }
  0x17   :  { %433 = vmatpush.bf16.msra.mxu2 %v403_v5  ;;  %434 = vmatpush.bf16.msra.mxu3 %v403_v5 }
  0x1a   :  { %189 = vmatpush.bf16.msra.mxu0 %v402_v6  ;;  %435 = vmatpush.bf16.msra.mxu1 %v402_v6 }
  0x1b   :  { %436 = vmatpush.bf16.msra.mxu2 %v402_v6  ;;  %437 = vmatpush.bf16.msra.mxu3 %v402_v6 }
  0x1e   :  { %190 = vmatpush.bf16.msra.mxu0 %v401_v7  ;;  %438 = vmatpush.bf16.msra.mxu1 %v401_v7 }
  0x1f   :  { %439 = vmatpush.bf16.msra.mxu2 %v401_v7  ;;  %440 = vmatpush.bf16.msra.mxu3 %v401_v7 }
  0x21   :  { %191 = vmatmul.bf16.vlgmr.msra.gmra.mxu0 %v409_v8  ;;  %201 = vmatmul.bf16.vlgmr.msra.gmra.mxu1 %v411_v9 }
  0x22   :  { %211 = vmatmul.bf16.vlgmr.msra.gmra.mxu2 %v413_v10  ;;  %221 = vmatmul.bf16.vlgmr.msra.gmra.mxu3 %v415_v11 }
  0x31   :  { %196 = vmatmul.bf16.gmra.mxu0 %v410_v12  ;;  %206 = vmatmul.bf16.gmra.mxu1 %v412_v13 }
  0x32   :  { %216 = vmatmul.bf16.gmra.mxu2 %v414_v14  ;;  %226 = vmatmul.bf16.gmra.mxu3 %v416_v15 }
  0x9e   :  { %v192_v18 = vpop.f32.mrf.mxu0  ;;  %v202_v19 = vpop.f32.mrf.mxu1 }
  0x9f   :  { %v299_v20 = vadd.f32 %v283_v16, %v192_v18  ;;  %v303_v21 = vadd.f32 %v287_v17, %v202_v19 }
  0xa1   :  { %315 = vst [vmem:[%s608_s3] sm:$0xff] %v299_v20 }
  0xa2   :  { %319 = vst [vmem:[%s608_s3 + $0x20] sm:$0xff] %v303_v21 }
  0xa5   :  { %v212_v26 = vpop.f32.mrf.mxu2  ;;  %v222_v27 = vpop.f32.mrf.mxu3 }
  0xa6   :  { %v194_v30 = vpop.f32.mrf.mxu0  ;;  %v204_v31 = vpop.f32.mrf.mxu1 }
  0xa9   :  { %v291_v22 = vld [vmem:[%s607_s2 + $0x40] sm:$0xff]  ;;  %v284_v24 = vld [vmem:[%s607_s2 + $0x8] sm:$0xff] }
  0xaa   :  { %v295_v23 = vld [vmem:[%s607_s2 + $0x60] sm:$0xff]  ;;  %v288_v25 = vld [vmem:[%s607_s2 + $0x28] sm:$0xff]  ;;  %v307_v28 = vadd.f32 %v291_v22, %v212_v26  ;;  %v300_v32 = vadd.f32 %v284_v24, %v194_v30 }
  0xab   :  { %v311_v29 = vadd.f32 %v295_v23, %v222_v27  ;;  %v304_v33 = vadd.f32 %v288_v25, %v204_v31 }
  0xac   :  { %323 = vst [vmem:[%s608_s3 + $0x40] sm:$0xff] %v307_v28 }
  0xad   :  { %327 = vst [vmem:[%s608_s3 + $0x60] sm:$0xff] %v311_v29  ;;  %v214_v38 = vpop.f32.mrf.mxu2  ;;  %v224_v39 = vpop.f32.mrf.mxu3 }
  0xae   :  { %316 = vst [vmem:[%s608_s3 + $0x8] sm:$0xff] %v300_v32  ;;  %v197_v42 = vpop.f32.mrf.mxu0  ;;  %v207_v43 = vpop.f32.mrf.mxu1 }
  0xaf   :  { %320 = vst [vmem:[%s608_s3 + $0x28] sm:$0xff] %v304_v33 }
  0xb5   :  { %v217_v50 = vpop.f32.mrf.mxu2  ;;  %v227_v51 = vpop.f32.mrf.mxu3 }
  0xb6   :  { %v292_v34 = vld [vmem:[%s607_s2 + $0x48] sm:$0xff]  ;;  %v285_v36 = vld [vmem:[%s607_s2 + $0x10] sm:$0xff]  ;;  %v199_v54 = vpop.f32.mrf.mxu0  ;;  %v209_v55 = vpop.f32.mrf.mxu1 }
  0xb7   :  { %v296_v35 = vld [vmem:[%s607_s2 + $0x68] sm:$0xff]  ;;  %v289_v37 = vld [vmem:[%s607_s2 + $0x30] sm:$0xff]  ;;  %v308_v40 = vadd.f32 %v292_v34, %v214_v38  ;;  %v301_v44 = vadd.f32 %v285_v36, %v197_v42 }
  0xb8   :  { %v312_v41 = vadd.f32 %v296_v35, %v224_v39  ;;  %v305_v45 = vadd.f32 %v289_v37, %v207_v43 }
  0xb9   :  { %324 = vst [vmem:[%s608_s3 + $0x48] sm:$0xff] %v308_v40 }
  0xba   :  { %328 = vst [vmem:[%s608_s3 + $0x68] sm:$0xff] %v312_v41 }
  0xbb   :  { %317 = vst [vmem:[%s608_s3 + $0x10] sm:$0xff] %v301_v44 }
  0xbc   :  { %321 = vst [vmem:[%s608_s3 + $0x30] sm:$0xff] %v305_v45 }
  0xbd   :  { %v219_v60 = vpop.f32.mrf.mxu2  ;;  %v229_v61 = vpop.f32.mrf.mxu3 }
  0xc3   :  { %v293_v46 = vld [vmem:[%s607_s2 + $0x50] sm:$0xff]  ;;  %v286_v48 = vld [vmem:[%s607_s2 + $0x18] sm:$0xff] }
  0xc4   :  { %v297_v47 = vld [vmem:[%s607_s2 + $0x70] sm:$0xff]  ;;  %v290_v49 = vld [vmem:[%s607_s2 + $0x38] sm:$0xff]  ;;  %v309_v52 = vadd.f32 %v293_v46, %v217_v50  ;;  %v302_v56 = vadd.f32 %v286_v48, %v199_v54 }
  0xc5   :  { %v313_v53 = vadd.f32 %v297_v47, %v227_v51  ;;  %v306_v57 = vadd.f32 %v290_v49, %v209_v55 }
  0xc6   :  { %325 = vst [vmem:[%s608_s3 + $0x50] sm:$0xff] %v309_v52 }
  0xc7   :  { %329 = vst [vmem:[%s608_s3 + $0x70] sm:$0xff] %v313_v53 }
  0xc8   :  { %318 = vst [vmem:[%s608_s3 + $0x18] sm:$0xff] %v302_v56 }
  0xc9   :  { %322 = vst [vmem:[%s608_s3 + $0x38] sm:$0xff] %v306_v57 }
  0xd0   :  { %v294_v58 = vld [vmem:[%s607_s2 + $0x58] sm:$0xff] }
  0xd1   :  { %v298_v59 = vld [vmem:[%s607_s2 + $0x78] sm:$0xff]  ;;  %v310_v62 = vadd.f32 %v294_v58, %v219_v60 }
  0xd2   :  { %v314_v63 = vadd.f32 %v298_v59, %v229_v61 }
  0xd3   :  { %326 = vst [vmem:[%s608_s3 + $0x58] sm:$0xff] %v310_v62 }
  0xd4   :  { %330 = vst [vmem:[%s608_s3 + $0x78] sm:$0xff] %v314_v63 }

</bundles_post_ra>
